<compile_context>
chip_gen: v7x
topology: tpu7x:2x2x1
jax: 0.10.0
libtpu: 0.0.40
codegen_flags: <defaults>
</compile_context>

<pallas_src>
import functools

import jax
import jax.numpy as jnp
from jax.experimental import pallas as pl
from jax.experimental.pallas import tpu as pltpu


def _gelu_tanh(x):
    # tanh-approximate GELU (== PyTorch F.gelu(approximate='tanh')); tanh runs
    # on the EUP so it is essentially free next to the MXU matmuls.
    # TODO(synk): PyTorch's default GELU is the exact erf form; erf has no
    # guaranteed Mosaic lowering, so we use the standard tanh approximation.
    c = jnp.float32(0.7978845608028654)  # sqrt(2/pi)
    return 0.5 * x * (1.0 + jnp.tanh(c * (x + 0.044715 * x * x * x)))


def _deep_dense_head_kernel(x_ref, w1_ref, b1_ref, w2_ref, b2_ref,
                            w3_ref, b3_ref, o_ref):
    x = x_ref[...].astype(jnp.float32)

    h = jnp.dot(x, w1_ref[...].astype(jnp.float32),
                preferred_element_type=jnp.float32) + b1_ref[...]
    h = _gelu_tanh(h)

    h = jnp.dot(h, w2_ref[...].astype(jnp.float32),
                preferred_element_type=jnp.float32) + b2_ref[...]
    h = _gelu_tanh(h)

    logits = jnp.dot(h, w3_ref[...].astype(jnp.float32),
                     preferred_element_type=jnp.float32) + b3_ref[...]

    # softmax over the output dimension (dim=1 of the (batch, out) input).
    m = jnp.max(logits, axis=-1, keepdims=True)
    e = jnp.exp(logits - m)
    denom = jnp.sum(e, axis=-1, keepdims=True)
    o_ref[...] = (e / denom).astype(o_ref.dtype)


def _round_up(x, m):
    return ((x + m - 1) // m) * m


@functools.partial(jax.jit, static_argnames=("block_m",))
def deep_dense_head(x, w1, b1, w2, b2, w3, b3, *, block_m=256):
    """y = softmax(gelu(gelu(x @ w1 + b1) @ w2 + b2) @ w3 + b3, axis=1)."""
    m, d_in = x.shape
    h1 = w1.shape[1]
    h2 = w2.shape[1]
    d_out = w3.shape[1]

    # Biases as 2-D (1, H) lane-major rows for clean VMEM layout.
    b1 = b1.reshape(1, h1)
    b2 = b2.reshape(1, h2)
    b3 = b3.reshape(1, d_out)

    # Row block: multiple of 8 sublanes; pad the batch so the grid divides evenly.
    bm = min(block_m, _round_up(m, 8))
    m_pad = _round_up(m, bm)
    if m_pad != m:
        x = jnp.pad(x, ((0, m_pad - m), (0, 0)))

    grid = (m_pad // bm,)

    out = pl.pallas_call(
        _deep_dense_head_kernel,
        out_shape=jax.ShapeDtypeStruct((m_pad, d_out), x.dtype),
        grid=grid,
        in_specs=[
            pl.BlockSpec((bm, d_in), lambda i: (i, 0)),    # x: tiled over batch rows
            pl.BlockSpec((d_in, h1), lambda i: (0, 0)),    # weights/biases: resident
            pl.BlockSpec((1, h1), lambda i: (0, 0)),
            pl.BlockSpec((h1, h2), lambda i: (0, 0)),
            pl.BlockSpec((1, h2), lambda i: (0, 0)),
            pl.BlockSpec((h2, d_out), lambda i: (0, 0)),
            pl.BlockSpec((1, d_out), lambda i: (0, 0)),
        ],
        out_specs=pl.BlockSpec((bm, d_out), lambda i: (i, 0)),
        compiler_params=pltpu.CompilerParams(
            dimension_semantics=("parallel",),
        ),
    )(x, w1, b1, w2, b2, w3, b3)

    return out[:m]


if __name__ == "__main__":
    key = jax.random.PRNGKey(0)

    # Small shapes consistent with the module: batch=8, input_dims=32,
    # hidden_dims=[64, 32], output_dims=16.
    batch, d_in, h1, h2, d_out = 8, 32, 64, 32, 16
    ks = jax.random.split(key, 7)

    x = jax.random.normal(ks[0], (batch, d_in), dtype=jnp.float32)
    w1 = jax.random.normal(ks[1], (d_in, h1), dtype=jnp.float32) / jnp.sqrt(d_in)
    b1 = 0.01 * jax.random.normal(ks[2], (h1,), dtype=jnp.float32)
    w2 = jax.random.normal(ks[3], (h1, h2), dtype=jnp.float32) / jnp.sqrt(h1)
    b2 = 0.01 * jax.random.normal(ks[4], (h2,), dtype=jnp.float32)
    w3 = jax.random.normal(ks[5], (h2, d_out), dtype=jnp.float32) / jnp.sqrt(h2)
    b3 = 0.01 * jax.random.normal(ks[6], (d_out,), dtype=jnp.float32)

    y = deep_dense_head(x, w1, b1, w2, b2, w3, b3)
    y = jax.block_until_ready(y)

    # Pure-JAX reference (same tanh-approx GELU).
    def ref_forward(xi):
        a = _gelu_tanh(xi @ w1 + b1)
        a = _gelu_tanh(a @ w2 + b2)
        return jax.nn.softmax(a @ w3 + b3, axis=1)

    y_ref = ref_forward(x)

    assert y.shape == (batch, d_out)
    assert y.dtype == x.dtype
    assert bool(jnp.allclose(jnp.sum(y, axis=1), 1.0, atol=1e-5))
    assert bool(jnp.allclose(y, y_ref, atol=1e-5, rtol=1e-5))

    print("KERNEL_OK")
</pallas_src>

<mosaic_0001>
module attributes {stable_mosaic.version = 11 : i64} {
  func.func @_deep_dense_head_kernel(%arg0: i32, %arg1: memref<8x32xf32, #tpu.memory_space<vmem>>, %arg2: memref<32x64xf32, #tpu.memory_space<vmem>>, %arg3: memref<1x64xf32, #tpu.memory_space<vmem>>, %arg4: memref<64x32xf32, #tpu.memory_space<vmem>>, %arg5: memref<1x32xf32, #tpu.memory_space<vmem>>, %arg6: memref<32x16xf32, #tpu.memory_space<vmem>>, %arg7: memref<1x16xf32, #tpu.memory_space<vmem>>, %arg8: memref<8x16xf32, #tpu.memory_space<vmem>>) attributes {dimension_semantics = [#tpu.dimension_semantics<parallel>], iteration_bounds = array<i64: 1>, scalar_prefetch = 0 : i64, scratch_operands = 0 : i64, tpu.core_type = #tpu.core_type<tc>, window_params = [{transform_indices = @transform_0, window_bounds = array<i64: 8, 32>}, {pipeline_mode = #tpu.pipeline_mode<synchronous>, transform_indices = @transform_1, window_bounds = array<i64: 32, 64>}, {pipeline_mode = #tpu.pipeline_mode<synchronous>, transform_indices = @transform_2, window_bounds = array<i64: 1, 64>}, {pipeline_mode = #tpu.pipeline_mode<synchronous>, transform_indices = @transform_3, window_bounds = array<i64: 64, 32>}, {pipeline_mode = #tpu.pipeline_mode<synchronous>, transform_indices = @transform_4, window_bounds = array<i64: 1, 32>}, {pipeline_mode = #tpu.pipeline_mode<synchronous>, transform_indices = @transform_5, window_bounds = array<i64: 32, 16>}, {pipeline_mode = #tpu.pipeline_mode<synchronous>, transform_indices = @transform_6, window_bounds = array<i64: 1, 16>}, {transform_indices = @transform_7, window_bounds = array<i64: 8, 16>}]} {
    %c0 = arith.constant 0 : index
    %c0_0 = arith.constant 0 : index
    %0 = vector.load %arg1[%c0, %c0_0] : memref<8x32xf32, #tpu.memory_space<vmem>>, vector<8x32xf32>
    %c0_1 = arith.constant 0 : index
    %c0_2 = arith.constant 0 : index
    %1 = vector.load %arg2[%c0_1, %c0_2] : memref<32x64xf32, #tpu.memory_space<vmem>>, vector<32x64xf32>
    %cst = arith.constant dense<0.000000e+00> : vector<8x64xf32>
    %2 = tpu.matmul %0, %1, %cst {dimension_numbers = #tpu.dot_dimension_numbers<[1], [0], [0], [1], [0, 0, 1, 1], [], []>} : vector<8x32xf32>, vector<32x64xf32>, vector<8x64xf32> -> vector<8x64xf32>
    %c0_3 = arith.constant 0 : index
    %c0_4 = arith.constant 0 : index
    %3 = vector.load %arg3[%c0_3, %c0_4] : memref<1x64xf32, #tpu.memory_space<vmem>>, vector<1x64xf32>
    %4 = vector.broadcast %3 : vector<1x64xf32> to vector<8x64xf32>
    %5 = arith.addf %2, %4 : vector<8x64xf32>
    %cst_5 = arith.constant 5.000000e-01 : f32
    %6 = vector.broadcast %cst_5 : f32 to vector<8x64xf32>
    %7 = arith.mulf %6, %5 : vector<8x64xf32>
    %cst_6 = arith.constant 4.471500e-02 : f32
    %8 = vector.broadcast %cst_6 : f32 to vector<8x64xf32>
    %9 = arith.mulf %8, %5 : vector<8x64xf32>
    %10 = arith.mulf %9, %5 : vector<8x64xf32>
    %11 = arith.mulf %10, %5 : vector<8x64xf32>
    %12 = arith.addf %5, %11 : vector<8x64xf32>
    %cst_7 = arith.constant 0.797884583 : f32
    %13 = vector.broadcast %cst_7 : f32 to vector<8x64xf32>
    %14 = arith.mulf %13, %12 : vector<8x64xf32>
    %15 = math.tanh %14 : vector<8x64xf32>
    %cst_8 = arith.constant 1.000000e+00 : f32
    %16 = vector.broadcast %cst_8 : f32 to vector<8x64xf32>
    %17 = arith.addf %16, %15 : vector<8x64xf32>
    %18 = arith.mulf %7, %17 : vector<8x64xf32>
    %c0_9 = arith.constant 0 : index
    %c0_10 = arith.constant 0 : index
    %19 = vector.load %arg4[%c0_9, %c0_10] : memref<64x32xf32, #tpu.memory_space<vmem>>, vector<64x32xf32>
    %cst_11 = arith.constant dense<0.000000e+00> : vector<8x32xf32>
    %20 = tpu.matmul %18, %19, %cst_11 {dimension_numbers = #tpu.dot_dimension_numbers<[1], [0], [0], [1], [0, 0, 1, 1], [], []>} : vector<8x64xf32>, vector<64x32xf32>, vector<8x32xf32> -> vector<8x32xf32>
    %c0_12 = arith.constant 0 : index
    %c0_13 = arith.constant 0 : index
    %21 = vector.load %arg5[%c0_12, %c0_13] : memref<1x32xf32, #tpu.memory_space<vmem>>, vector<1x32xf32>
    %22 = vector.broadcast %21 : vector<1x32xf32> to vector<8x32xf32>
    %23 = arith.addf %20, %22 : vector<8x32xf32>
    %cst_14 = arith.constant 5.000000e-01 : f32
    %24 = vector.broadcast %cst_14 : f32 to vector<8x32xf32>
    %25 = arith.mulf %24, %23 : vector<8x32xf32>
    %cst_15 = arith.constant 4.471500e-02 : f32
    %26 = vector.broadcast %cst_15 : f32 to vector<8x32xf32>
    %27 = arith.mulf %26, %23 : vector<8x32xf32>
    %28 = arith.mulf %27, %23 : vector<8x32xf32>
    %29 = arith.mulf %28, %23 : vector<8x32xf32>
    %30 = arith.addf %23, %29 : vector<8x32xf32>
    %cst_16 = arith.constant 0.797884583 : f32
    %31 = vector.broadcast %cst_16 : f32 to vector<8x32xf32>
    %32 = arith.mulf %31, %30 : vector<8x32xf32>
    %33 = math.tanh %32 : vector<8x32xf32>
    %cst_17 = arith.constant 1.000000e+00 : f32
    %34 = vector.broadcast %cst_17 : f32 to vector<8x32xf32>
    %35 = arith.addf %34, %33 : vector<8x32xf32>
    %36 = arith.mulf %25, %35 : vector<8x32xf32>
    %c0_18 = arith.constant 0 : index
    %c0_19 = arith.constant 0 : index
    %37 = vector.load %arg6[%c0_18, %c0_19] : memref<32x16xf32, #tpu.memory_space<vmem>>, vector<32x16xf32>
    %cst_20 = arith.constant dense<0.000000e+00> : vector<8x16xf32>
    %38 = tpu.matmul %36, %37, %cst_20 {dimension_numbers = #tpu.dot_dimension_numbers<[1], [0], [0], [1], [0, 0, 1, 1], [], []>} : vector<8x32xf32>, vector<32x16xf32>, vector<8x16xf32> -> vector<8x16xf32>
    %c0_21 = arith.constant 0 : index
    %c0_22 = arith.constant 0 : index
    %39 = vector.load %arg7[%c0_21, %c0_22] : memref<1x16xf32, #tpu.memory_space<vmem>>, vector<1x16xf32>
    %40 = vector.broadcast %39 : vector<1x16xf32> to vector<8x16xf32>
    %41 = arith.addf %38, %40 : vector<8x16xf32>
    %cst_23 = arith.constant dense<0xFF800000> : vector<8xf32>
    %42 = vector.multi_reduction <maximumf>, %41, %cst_23 [1] : vector<8x16xf32> to vector<8xf32>
    %43 = vector.shape_cast %42 : vector<8xf32> to vector<8x1xf32>
    %44 = vector.broadcast %43 : vector<8x1xf32> to vector<8x16xf32>
    %45 = arith.subf %41, %44 : vector<8x16xf32>
    %46 = math.exp %45 : vector<8x16xf32>
    %cst_24 = arith.constant dense<0.000000e+00> : vector<8xf32>
    %47 = vector.multi_reduction <add>, %46, %cst_24 [1] : vector<8x16xf32> to vector<8xf32>
    %48 = vector.shape_cast %47 : vector<8xf32> to vector<8x1xf32>
    %49 = vector.broadcast %48 : vector<8x1xf32> to vector<8x16xf32>
    %50 = arith.divf %46, %49 : vector<8x16xf32>
    %c0_25 = arith.constant 0 : index
    %c0_26 = arith.constant 0 : index
    %51 = vector.load %arg8[%c0_25, %c0_26] : memref<8x16xf32, #tpu.memory_space<vmem>>, vector<8x16xf32>
    tpu.vector_store %arg8[%c0_25, %c0_26], %50 {strides = array<i32>} : memref<8x16xf32, #tpu.memory_space<vmem>>, vector<8x16xf32>,
    return
  }
  func.func @transform_0(%arg0: i32) -> (i32, i32) {
    %c0_i32 = arith.constant 0 : i32
    %c0_i32_0 = arith.constant 0 : i32
    return %arg0, %c0_i32 : i32, i32
  }
  func.func @transform_1(%arg0: i32) -> (i32, i32) {
    %c0_i32 = arith.constant 0 : i32
    %c0_i32_0 = arith.constant 0 : i32
    %c0_i32_1 = arith.constant 0 : i32
    return %c0_i32, %c0_i32_0 : i32, i32
  }
  func.func @transform_2(%arg0: i32) -> (i32, i32) {
    %c0_i32 = arith.constant 0 : i32
    %c0_i32_0 = arith.constant 0 : i32
    %c0_i32_1 = arith.constant 0 : i32
    return %c0_i32, %c0_i32_0 : i32, i32
  }
  func.func @transform_3(%arg0: i32) -> (i32, i32) {
    %c0_i32 = arith.constant 0 : i32
    %c0_i32_0 = arith.constant 0 : i32
    %c0_i32_1 = arith.constant 0 : i32
    return %c0_i32, %c0_i32_0 : i32, i32
  }
  func.func @transform_4(%arg0: i32) -> (i32, i32) {
    %c0_i32 = arith.constant 0 : i32
    %c0_i32_0 = arith.constant 0 : i32
    %c0_i32_1 = arith.constant 0 : i32
    return %c0_i32, %c0_i32_0 : i32, i32
  }
  func.func @transform_5(%arg0: i32) -> (i32, i32) {
    %c0_i32 = arith.constant 0 : i32
    %c0_i32_0 = arith.constant 0 : i32
    %c0_i32_1 = arith.constant 0 : i32
    return %c0_i32, %c0_i32_0 : i32, i32
  }
  func.func @transform_6(%arg0: i32) -> (i32, i32) {
    %c0_i32 = arith.constant 0 : i32
    %c0_i32_0 = arith.constant 0 : i32
    %c0_i32_1 = arith.constant 0 : i32
    return %c0_i32, %c0_i32_0 : i32, i32
  }
  func.func @transform_7(%arg0: i32) -> (i32, i32) {
    %c0_i32 = arith.constant 0 : i32
    %c0_i32_0 = arith.constant 0 : i32
    return %arg0, %c0_i32 : i32, i32
  }
}

</mosaic_0001>

<bundles_post_ra>
// kernel: deep_dense_head.1
= control target key start
LH: loop header
LB: loop body
LE: loop exit
PB: predicated region body
PF: predicated region fallthrough
CT: control target
= control target key end

     0   :  { %v457_v3 = vmov 0.0|0.0   ;;  %vm458_vm0 = vmmov 0   ;;  %v459_v6 = vmov 0.0   ;;  %s578_s0 = inlined_call_operand.vmem [shape: f32[8,32], index: 0, kind: input, shape index: {}]   ;;  %s579_s1 = inlined_call_operand.vmem [shape: f32[32,64], index: 1, kind: input, shape index: {}]   ;;  %s580_s2 = inlined_call_operand.vmem [shape: f32[1,64], index: 2, kind: input, shape index: {}]   ;;  %s581_s3 = inlined_call_operand.vmem [shape: f32[64,32], index: 3, kind: input, shape index: {}]   ;;  %s582_s4 = inlined_call_operand.vmem [shape: f32[1,32], index: 4, kind: input, shape index: {}]   ;;  %s583_s5 = inlined_call_operand.vmem [shape: f32[32,16], index: 5, kind: input, shape index: {}]   ;;  %s584_s6 = inlined_call_operand.vmem [shape: f32[1,16], index: 6, kind: input, shape index: {}]   ;;  %s585_s7 = inlined_call_operand.hbm [shape: f32[8,16], index: 7, kind: output, shape index: {}]  }
   0x1   :  { %v28_v0 = vld [vmem:[%s579_s1] sm:$0xff]  ;;  %v29_v1 = vld [vmem:[%s579_s1 + $0x8] sm:$0xff]  ;;  %v30_v2 = vld [vmem:[%s579_s1 + $0x10] sm:$0xff]  ;;  %397 = vmatprep.subr.bf16.mxu0 %v457_v3  ;;  %364 = vmatprep.mubr.msk.f32.mxu0 %vm458_vm0, %v459_v6 }
   0x2   :  { %v398_v4 = vpack.c.bf16 %v29_v1, %v28_v0  ;;  %v31_v5 = vld [vmem:[%s579_s1 + $0x18] sm:$0xff]  ;;  %403 = vmatprep.subr.bf16.mxu1 %v457_v3  ;;  %383 = vmatprep.mubr.msk.f32.mxu1 %vm458_vm0, %v459_v6 }
   0x3   :  { %12 = vsyncpa [#allocation3], 0  ;;  %v401_v7 = vpack.c.bf16 %v31_v5, %v30_v2  ;;  %v27_v8 = vld [vmem:[%s578_s0] sm:$0xff]  ;;  %vm39_vm1 = vcmask 261120   ;;  %v123_v10 = vld [vmem:[%s581_s3 + $0x8] sm:$0xff]  ;;  %vm137_vm2 = vcmask 523264  }
   0x4   :  { %399 = vmatpush3.bf16.msra.mxu0 %v398_v4  ;;  %v122_v9 = vld [vmem:[%s581_s3] sm:$0xff]  ;;  %v124_v11 = vld [vmem:[%s581_s3 + $0x10] sm:$0xff]  ;;  %v125_v13 = vld [vmem:[%s581_s3 + $0x18] sm:$0xff]  ;;  %vm304_vm3 = vcmask 130048  }
   0x5   :  { %400 = vmatprep.subr.bf16.mxu0 %v457_v3  ;;  %v404_v12 = vpack.c.bf16 %v123_v10, %v122_v9  ;;  %v407_v14 = vpack.c.bf16 %v125_v13, %v124_v11  ;;  %v126_v15 = vld [vmem:[%s581_s3 + $0x20] sm:$0xff]  ;;  %v127_v16 = vld [vmem:[%s581_s3 + $0x28] sm:$0xff]  ;;  %v128_v18 = vld [vmem:[%s581_s3 + $0x30] sm:$0xff] }
   0x6   :  { %v410_v17 = vpack.c.bf16 %v127_v16, %v126_v15  ;;  %v129_v19 = vld [vmem:[%s581_s3 + $0x38] sm:$0xff]  ;;  %v331_v21 = vld [vmem:[%s580_s2] ss:$0 sm:$0xff]  ;;  %v221_v35 = vld [vmem:[%s583_s5 + $0x8] sm:$0xff] }
   0x7   :  { %405 = vmatpush3.bf16.msra.mxu1 %v404_v12  ;;  %v413_v20 = vpack.c.bf16 %v129_v19, %v128_v18  ;;  %v220_v34 = vld [vmem:[%s583_s5] sm:$0xff]  ;;  %v222_v36 = vld [vmem:[%s583_s5 + $0x10] sm:$0xff]  ;;  %v223_v38 = vld [vmem:[%s583_s5 + $0x18] sm:$0xff] }
   0x8   :  { %402 = vmatpush3.bf16.msra.mxu0 %v401_v7  ;;  %406 = vmatprep.subr.bf16.mxu1 %v457_v3  ;;  %v416_v37 = vpack.c.bf16 %v221_v35, %v220_v34  ;;  %v419_v39 = vpack.c.bf16 %v223_v38, %v222_v36  ;;  %v333_v40 = vld [vmem:[%s582_s4] ss:$0 sm:$0xff]  ;;  %s460_s4 = smov [#allocation2]  }
   0x9   :  { %415 = vmatprep.subr.bf16.mxu0 %v457_v3  ;;  %v335_v53 = vld [vmem:[%s584_s6] ss:$0 sm:$0xff]  ;;  %s323_s12 = sshll.u32 %s460_s4, 4  ;;  %s324_s12 = int_to_ptr.vmem [resolvable:$true] %s323_s12 }
   0xa   :  { %s433_s6 = scalar_lea.vmem %s324_s12, 128  ;;  %p438_p1 = scmp.lt.s32.totalorder %s324_s12, %s324_s12 }
   0xb   :  { %365 = vmatmul.mubr.msk.f32.vlgmr.msra.gmra.mrb[0].mxu0 %vm39_vm1, %v27_v8  ;;  %408 = vmatpush3.bf16.msra.mxu1 %v407_v14  ;;  %p434_p0 = scmp.ne.s32.totalorder %s324_s12, %s433_s6  ;;  %p439_p2 = scmp.lt.s32.totalorder %s433_s6, %s433_s6 }
   0xc   :  { %394 = vmatprep.mubr.msk.f32.mxu0 %vm458_vm0, %v459_v6  ;;  %409 = vmatprep.subr.bf16.mxu1 %v457_v3 }
   0xd   :  { %417 = vmatpush3.bf16.msra.mxu0 %v416_v37  ;;  %p440_p3 = por %p439_p2, %p438_p1 }
   0xe   :  { %418 = vmatprep.subr.bf16.mxu0 %v457_v3 }
   0xf   :  { %411 = vmatpush3.bf16.msra.mxu1 %v410_v17  ;;  %p441_p4 = pnand %p440_p3, %p434_p0 }
  0x10   :  { %412 = vmatprep.subr.bf16.mxu1 %v457_v3 }
  0x11   :  { %420 = vmatpush3.bf16.msra.mxu0 %v419_v39 }
  0x13   :  { %414 = vmatpush3.bf16.msra.mxu1 %v413_v20 }
  0xde   :  { %v109_v22 = vpop.f32.mrb[0].mxu0 }
  0xdf   :  { %v110_v23 = vadd.f32 %v331_v21, %v109_v22  ;;  %v366_v24 = vpop.f32.mrb[1].mxu0 }
  0xe1   :  { %v114_v25 = vmul.f32 0.044715, %v110_v23  ;;  %v113_v31 = vmul.f32 0.5, %v110_v23 }
  0xe3   :  { %v115_v26 = vmul.f32 %v114_v25, %v110_v23 }
  0xe5   :  { %v116_v27 = vmul.f32 %v115_v26, %v110_v23 }
  0xe7   :  { %v117_v28 = vadd.f32 %v116_v27, %v110_v23 }
  0xe9   :  { %v118_v29 = vmul.f32 0.7978846, %v117_v28 }
  0xeb   :  { %425 = vtanh.f32 %v118_v29 }
  0xf5   :  { %v426_v30 = vpop.eup %425 }
  0xf6   :  { %v120_v32 = vadd.f32 1.0, %v426_v30 }
  0xf8   :  { %v121_v33 = vmul.f32 %v120_v32, %v113_v31 }
  0xfa   :  { %384 = vmatmul.mubr.msk.f32.vlgmr.msra.gmra.mrb[0].mxu1 %vm137_vm2, %v121_v33 }
 0x1cd   :  { %v207_v41 = vpop.f32.mrb[0].mxu1 }
 0x1ce   :  { %v208_v42 = vadd.f32 %v333_v40, %v207_v41  ;;  %v385_v43 = vpop.f32.mrb[1].mxu1 }
 0x1d0   :  { %v212_v44 = vmul.f32 0.044715, %v208_v42  ;;  %v211_v50 = vmul.f32 0.5, %v208_v42 }
 0x1d2   :  { %v213_v45 = vmul.f32 %v212_v44, %v208_v42 }
 0x1d4   :  { %v214_v46 = vmul.f32 %v213_v45, %v208_v42 }
 0x1d6   :  { %v215_v47 = vadd.f32 %v214_v46, %v208_v42 }
 0x1d8   :  { %v216_v48 = vmul.f32 0.7978846, %v215_v47 }
 0x1da   :  { %427 = vtanh.f32 %v216_v48 }
 0x1e4   :  { %v428_v49 = vpop.eup %427 }
 0x1e5   :  { %v218_v51 = vadd.f32 1.0, %v428_v49 }
 0x1e7   :  { %v219_v52 = vmul.f32 %v218_v51, %v211_v50 }
 0x1e9   :  { %395 = vmatmul.mubr.msk.f32.vlgmr.msra.gmra.mrb[2].mxu0 %vm39_vm1, %v219_v52 }
 0x2bc   :  { %v300_v54 = vpop.f32.mrb[2].mxu0 }
 0x2bd   :  { %v301_v55 = vadd.f32 %v335_v53, %v300_v54  ;;  %v396_v56 = vpop.f32.mrb[3].mxu0 }
 0x2bf   :  { %v305_v57 = vsel %vm304_vm3, %v301_v55, -inf }
 0x2c0   :  { %306 = vmax.xlane.f32.xlu0 %v305_v57 }
 0x34d   :  { %v307_v58 = vpop.xlane.xlu0 %306 }
 0x34e   :  { %v308_v59 = vsub.f32 %v301_v55, %v307_v58 }
 0x350   :  { %v309_v60 = vmul.f32 1.442695, %v308_v59 }
 0x352   :  { %429 = vpow2.f32 %v309_v60 }
 0x35c   :  { %v430_v61 = vpop.eup %429 }
 0x35d   :  { %v311_v62 = vsel %vm304_vm3, %v430_v61, 0.0 }
 0x35e   :  { %312 = vadd.xlane.f32.xlu0 %v311_v62 }
 0x3eb   :  { %v313_v63 = vpop.xlane.xlu0 %312 }
 0x3ec   :  { %431 = vrcp.f32 %v313_v63 }
 0x3f6   :  { %v432_v0 = vpop.eup %431 }
 0x3f7   :  { %v315_v1 = vmul.f32 %v432_v0, %v430_v61 }
 0x3f9   :  { %316 = vst.msk [vmem:[#allocation2] sm:$0xff] %vm304_vm3, %v315_v1 }
 0x3fa   :  { %444 = shalt.err (!%p441_p4)
}
 0x3fb   :  { %s445_s15 = scalar_lea.hbm %s585_s7, 128 }
 0x3fc   :  { %p446_p5 = scmp.ne.s32.totalorder %s585_s7, %s445_s15  ;;  %p449_p6 = scmp.lt.u32.totalorder %s445_s15, %s585_s7 }
 0x3fe   :  { %p451_p7 = pnand %p449_p6, %p446_p5 }
 0x400   :  { %454 = shalt.err (!%p451_p7)
}
 0x401   :  { %326 = dma.vmem_to_hbm [thread:$0]  %s324_s12, 128, %s585_s7, [#allocation3]  }
 0x402   :  { %455 = dma.done.wait [#allocation3], 128  }
 0x403   :  { %456 = vsyncadd [#allocation3], 4294967168 }
 0x404   :  { %330 = vsyncpa [#allocation3], 1 }

</bundles_post_ra>
